<compile_context>
chip_gen: v7x
topology: tpu7x:2x2x1
jax: 0.10.0
libtpu: 0.0.40
codegen_flags: <defaults>
</compile_context>

<pallas_src>
import jax
import jax.numpy as jnp
from jax.experimental import pallas as pl
from jax.experimental.pallas import tpu as pltpu

_SUBLANES = 8          # f32 sublane packing
_BF16_SUBLANES = 16    # bf16 sublane packing (MXU LHS after the in-kernel cast)


def _round_up(x, m):
    return ((x + m - 1) // m) * m


def _linear_kernel(x_ref, wt_ref, b_ref, o_ref):
    # x_ref : (TB, K)  f32 batch tile (auto double-buffered over the grid)
    # wt_ref: (K, N)   compute-dtype W^T, VMEM-resident across the whole grid
    # b_ref : (1, N)   f32 bias, VMEM-resident
    # o_ref : (TB, N)  f32; tail rows past B are masked by Pallas on store
    x = x_ref[...].astype(wt_ref.dtype)        # VPU cast, hides under the input DMA
    acc = jnp.dot(x, wt_ref[...], preferred_element_type=jnp.float32)
    o_ref[...] = (acc + b_ref[...]).astype(o_ref.dtype)


def prepare_linear_params(weight, bias, compute_dtype=jnp.bfloat16):
    """One-time parameter prep. Cache the result next to the weights and refresh
    only when the weights change (removes a per-forward transpose/cast pass)."""
    wt = weight.T.astype(compute_dtype)              # (K, N)
    b2d = bias.astype(jnp.float32).reshape(1, -1)    # (1, N)
    return wt, b2d


def linear_net_apply(x, wt, b2d, *, block_b=512, out_dtype=jnp.float32):
    """x @ W.T + b with pre-prepared (W^T, bias) from prepare_linear_params."""
    B, num_inp = x.shape
    k2, num_out = wt.shape
    assert k2 == num_inp and b2d.shape == (1, num_out)

    # Batch tile: aim for >= 2 grid blocks once B >= 32 so the "parallel" axis can
    # split across v7x's two TensorCores; cap tiles at block_b for large batches.
    if B >= 2 * _BF16_SUBLANES:
        n_blocks = max(2, pl.cdiv(B, block_b))
    else:
        n_blocks = 1
    tb = _round_up(pl.cdiv(B, n_blocks), _BF16_SUBLANES)
    tb = min(tb, _round_up(B, _SUBLANES))   # don't overhang more than one row-tile
    grid_b = pl.cdiv(B, tb)

    cost = pl.CostEstimate(
        flops=2 * B * num_inp * num_out,
        transcendentals=0,
        bytes_accessed=(x.size * x.dtype.itemsize
                        + wt.size * wt.dtype.itemsize
                        + b2d.size * b2d.dtype.itemsize
                        + B * num_out * jnp.dtype(out_dtype).itemsize),
    )

    # NOTE: W^T stays fully VMEM-resident (trivial at K=num_inp=128). If num_inp
    # grows to real flattened-frame sizes (thousands), add an innermost
    # "arbitrary" K grid axis with an f32 VMEM accumulator (pl.when init/finalize)
    # or raise vmem_limit_bytes.
    return pl.pallas_call(
        _linear_kernel,
        out_shape=jax.ShapeDtypeStruct((B, num_out), out_dtype),
        grid=(grid_b,),
        in_specs=[
            pl.BlockSpec((tb, num_inp), lambda i: (i, 0)),       # x: tiled over batch
            pl.BlockSpec((num_inp, num_out), lambda i: (0, 0)),  # W^T: resident
            pl.BlockSpec((1, num_out), lambda i: (0, 0)),        # bias: resident
        ],
        out_specs=pl.BlockSpec((tb, num_out), lambda i: (i, 0)),
        compiler_params=pltpu.CompilerParams(
            dimension_semantics=("parallel",),
        ),
        cost_estimate=cost,
    )(x, wt, b2d)


def linear_net_forward(x, weight, bias, *, block_b=512,
                       compute_dtype=jnp.bfloat16, out_dtype=jnp.float32):
    """Pallas forward for LinearNet: x @ weight.T + bias.

    x:      [B, num_inp] float32
    weight: [num_out, num_inp] float32 (PyTorch nn.Linear layout)
    bias:   [num_out] float32
    returns [B, num_out] out_dtype
    """
    wt, b2d = prepare_linear_params(weight, bias, compute_dtype)
    return linear_net_apply(x, wt, b2d, block_b=block_b, out_dtype=out_dtype)


if __name__ == "__main__":
    # Small, deterministic shapes consistent with a linear Q-network head.
    batch = 8
    num_inp = 128    # flattened observation features
    num_out = 8      # number of actions

    key = jax.random.PRNGKey(0)
    kx, kb, kw, kx2 = jax.random.split(key, 4)

    x = jax.random.normal(kx, (batch, num_inp), dtype=jnp.float32)

    # LinearNet.__init__: weight zero-initialized (nn.init.zeros_); bias keeps the
    # PyTorch default U(+/- 1/sqrt(fan_in)), generated deterministically here.
    weight = jnp.zeros((num_out, num_inp), dtype=jnp.float32)
    bound = 1.0 / (num_inp ** 0.5)
    bias = jax.random.uniform(kb, (num_out,), dtype=jnp.float32,
                              minval=-bound, maxval=bound)

    out = jax.block_until_ready(linear_net_forward(x, weight, bias))
    assert out.shape == (batch, num_out)
    ref = x @ weight.T + bias                # zero W -> exactly a bias broadcast
    assert jnp.allclose(out, ref, atol=1e-6), "mismatch vs reference (zero W)"

    # Non-zero weights (as after training updates); reference applies the same
    # bf16 operand rounding with f32 accumulation.
    w2 = jax.random.uniform(kw, (num_out, num_inp), dtype=jnp.float32,
                            minval=-bound, maxval=bound)
    out2 = jax.block_until_ready(linear_net_forward(x, w2, bias))
    ref2 = (x.astype(jnp.bfloat16).astype(jnp.float32)
            @ w2.astype(jnp.bfloat16).astype(jnp.float32).T) + bias
    assert jnp.allclose(out2, ref2, atol=1e-3, rtol=1e-3), "mismatch vs reference"

    # Ragged batch exercises the partial tail block / masked-store path.
    x3 = jax.random.normal(kx2, (37, num_inp), dtype=jnp.float32)
    out3 = jax.block_until_ready(linear_net_forward(x3, w2, bias))
    ref3 = (x3.astype(jnp.bfloat16).astype(jnp.float32)
            @ w2.astype(jnp.bfloat16).astype(jnp.float32).T) + bias
    assert out3.shape == (37, num_out)
    assert jnp.allclose(out3, ref3, atol=1e-3, rtol=1e-3), "mismatch (ragged batch)"

    print("KERNEL_OK")
</pallas_src>

<mosaic_0001>
module attributes {stable_mosaic.version = 11 : i64} {
  func.func @_linear_kernel(%arg0: i32, %arg1: memref<8x128xf32, #tpu.memory_space<vmem>>, %arg2: memref<128x8xbf16, #tpu.memory_space<vmem>>, %arg3: memref<1x8xf32, #tpu.memory_space<vmem>>, %arg4: memref<8x8xf32, #tpu.memory_space<vmem>>) attributes {dimension_semantics = [#tpu.dimension_semantics<parallel>], iteration_bounds = array<i64: 1>, scalar_prefetch = 0 : i64, scratch_operands = 0 : i64, tpu.core_type = #tpu.core_type<tc>, window_params = [{transform_indices = @transform_0, window_bounds = array<i64: 8, 128>}, {pipeline_mode = #tpu.pipeline_mode<synchronous>, transform_indices = @transform_1, window_bounds = array<i64: 128, 8>}, {pipeline_mode = #tpu.pipeline_mode<synchronous>, transform_indices = @transform_2, window_bounds = array<i64: 1, 8>}, {transform_indices = @transform_3, window_bounds = array<i64: 8, 8>}]} {
    %c0 = arith.constant 0 : index
    %c0_0 = arith.constant 0 : index
    %0 = vector.load %arg1[%c0, %c0_0] : memref<8x128xf32, #tpu.memory_space<vmem>>, vector<8x128xf32>
    %1 = arith.truncf %0 : vector<8x128xf32> to vector<8x128xbf16>
    %c0_1 = arith.constant 0 : index
    %c0_2 = arith.constant 0 : index
    %2 = vector.load %arg2[%c0_1, %c0_2] : memref<128x8xbf16, #tpu.memory_space<vmem>>, vector<128x8xbf16>
    %cst = arith.constant dense<0.000000e+00> : vector<8x8xf32>
    %3 = tpu.matmul %1, %2, %cst {dimension_numbers = #tpu.dot_dimension_numbers<[1], [0], [0], [1], [0, 0, 1, 1], [], []>} : vector<8x128xbf16>, vector<128x8xbf16>, vector<8x8xf32> -> vector<8x8xf32>
    %c0_3 = arith.constant 0 : index
    %c0_4 = arith.constant 0 : index
    %4 = vector.load %arg3[%c0_3, %c0_4] : memref<1x8xf32, #tpu.memory_space<vmem>>, vector<1x8xf32>
    %5 = vector.broadcast %4 : vector<1x8xf32> to vector<8x8xf32>
    %6 = arith.addf %3, %5 : vector<8x8xf32>
    %c0_5 = arith.constant 0 : index
    %c0_6 = arith.constant 0 : index
    %7 = vector.load %arg4[%c0_5, %c0_6] : memref<8x8xf32, #tpu.memory_space<vmem>>, vector<8x8xf32>
    tpu.vector_store %arg4[%c0_5, %c0_6], %6 {strides = array<i32>} : memref<8x8xf32, #tpu.memory_space<vmem>>, vector<8x8xf32>,
    return
  }
  func.func @transform_0(%arg0: i32) -> (i32, i32) {
    %c0_i32 = arith.constant 0 : i32
    %c0_i32_0 = arith.constant 0 : i32
    return %arg0, %c0_i32 : i32, i32
  }
  func.func @transform_1(%arg0: i32) -> (i32, i32) {
    %c0_i32 = arith.constant 0 : i32
    %c0_i32_0 = arith.constant 0 : i32
    %c0_i32_1 = arith.constant 0 : i32
    return %c0_i32, %c0_i32_0 : i32, i32
  }
  func.func @transform_2(%arg0: i32) -> (i32, i32) {
    %c0_i32 = arith.constant 0 : i32
    %c0_i32_0 = arith.constant 0 : i32
    %c0_i32_1 = arith.constant 0 : i32
    return %c0_i32, %c0_i32_0 : i32, i32
  }
  func.func @transform_3(%arg0: i32) -> (i32, i32) {
    %c0_i32 = arith.constant 0 : i32
    %c0_i32_0 = arith.constant 0 : i32
    return %arg0, %c0_i32 : i32, i32
  }
}

</mosaic_0001>

<bundles_post_ra>
// kernel: tpu_custom_call.1
= control target key start
LH: loop header
LB: loop body
LE: loop exit
PB: predicated region body
PF: predicated region fallthrough
CT: control target
= control target key end

     0   :  { %v218_v1 = vmov 0.0   ;;  %vm219_vm0 = vmmov 0   ;;  %s283_s0 = inlined_call_operand.vmem [shape: f32[8,128], index: 0, kind: input, shape index: {}]   ;;  %s284_s1 = inlined_call_operand.vmem [shape: bf16[128,8], index: 1, kind: input, shape index: {}]   ;;  %s285_s2 = inlined_call_operand.vmem [shape: f32[1,8], index: 2, kind: input, shape index: {}]   ;;  %s286_s3 = inlined_call_operand.hbm [shape: f32[8,8], index: 3, kind: output, shape index: {}]  }
   0x1   :  { %v186_v0 = vld [vmem:[%s284_s1] sm:$0xff]   ;;  %163 = vmatprep.subr.bf16.mxu0 %v218_v1  ;;  %v187_v2 = vld [vmem:[%s284_s1 + $0x8] sm:$0xff]   ;;  %179 = vmatprep.mubr.msk.bf16.mxu0 %vm219_vm0, %v218_v1  ;;  %v188_v3 = vld [vmem:[%s284_s1 + $0x10] sm:$0xff]  }
   0x2   :  { %164 = vmatpush3.bf16.msra.mxu0 %v186_v0 }
   0x3   :  { %165 = vmatprep.subr.bf16.mxu0 %v218_v1 }
   0x6   :  { %166 = vmatpush3.bf16.msra.mxu0 %v187_v2 }
   0x7   :  { %167 = vmatprep.subr.bf16.mxu0 %v218_v1 }
   0x8   :  { %8 = vsyncpa [#allocation3], 0  ;;  %v189_v4 = vld [vmem:[%s284_s1 + $0x18] sm:$0xff]   ;;  %v190_v5 = vld [vmem:[%s284_s1 + $0x20] sm:$0xff]   ;;  %s220_s5 = smov [#allocation2]   ;;  %vm129_vm1 = vcmask 64512  }
   0x9   :  { %v191_v6 = vld [vmem:[%s284_s1 + $0x28] sm:$0xff]   ;;  %v192_v7 = vld [vmem:[%s284_s1 + $0x30] sm:$0xff]   ;;  %v193_v8 = vld [vmem:[%s284_s1 + $0x38] sm:$0xff]   ;;  %s137_s6 = sshll.u32 %s220_s5, 4  ;;  %s138_s6 = int_to_ptr.vmem [resolvable:$true] %s137_s6 }
   0xa   :  { %168 = vmatpush3.bf16.msra.mxu0 %v188_v3  ;;  %v16_v9 = vld [vmem:[%s283_s0] sm:$0xff]  ;;  %s194_s1 = scalar_lea.vmem %s138_s6, 128  ;;  %p199_p1 = scmp.lt.s32.totalorder %s138_s6, %s138_s6 }
   0xb   :  { %169 = vmatprep.subr.bf16.mxu0 %v218_v1  ;;  %v17_v10 = vpack.c.bf16 %v16_v9, %v16_v9  ;;  %v145_v11 = vld [vmem:[%s285_s2] ss:$0 sm:$0xff]  ;;  %p195_p0 = scmp.ne.s32.totalorder %s138_s6, %s194_s1  ;;  %p200_p2 = scmp.lt.s32.totalorder %s194_s1, %s194_s1 }
   0xd   :  { %p201_p3 = por %p200_p2, %p199_p1 }
   0xe   :  { %170 = vmatpush3.bf16.msra.mxu0 %v189_v4 }
   0xf   :  { %171 = vmatprep.subr.bf16.mxu0 %v218_v1  ;;  %p202_p4 = pnand %p201_p3, %p195_p0 }
  0x12   :  { %172 = vmatpush3.bf16.msra.mxu0 %v190_v5 }
  0x13   :  { %173 = vmatprep.subr.bf16.mxu0 %v218_v1 }
  0x16   :  { %174 = vmatpush3.bf16.msra.mxu0 %v191_v6 }
  0x17   :  { %175 = vmatprep.subr.bf16.mxu0 %v218_v1 }
  0x1a   :  { %176 = vmatpush3.bf16.msra.mxu0 %v192_v7 }
  0x1b   :  { %177 = vmatprep.subr.bf16.mxu0 %v218_v1 }
  0x1e   :  { %178 = vmatpush3.bf16.msra.mxu0 %v193_v8 }
  0x21   :  { %180 = vmatmul.mubr.bf16.vlgmr.msra.gmra.mrb[0].mxu0 %v17_v10 }
  0xf4   :  { %v123_v12 = vpop.f32.mrb[0].mxu0 }
  0xf5   :  { %v124_v13 = vadd.f32 %v145_v11, %v123_v12  ;;  %v181_v14 = vpop.f32.mrb[1].mxu0 }
  0xf6   :  { %v126_v15 = vpop.f32.mrb[2].mxu0 }
  0xf7   :  { %v182_v16 = vpop.f32.mrb[3].mxu0  ;;  %130 = vst.msk [vmem:[#allocation2] sm:$0xff] %vm129_vm1, %v124_v13 }
  0xf8   :  { %205 = shalt.err (!%p202_p4)
}
  0xf9   :  { %s206_s2 = scalar_lea.hbm %s286_s3, 128 }
  0xfa   :  { %p207_p5 = scmp.ne.s32.totalorder %s286_s3, %s206_s2  ;;  %p210_p6 = scmp.lt.u32.totalorder %s206_s2, %s286_s3 }
  0xfc   :  { %p212_p7 = pnand %p210_p6, %p207_p5 }
  0xfe   :  { %215 = shalt.err (!%p212_p7)
}
  0xff   :  { %140 = dma.vmem_to_hbm [thread:$0]  %s138_s6, 128, %s286_s3, [#allocation3]  }
 0x100   :  { %216 = dma.done.wait [#allocation3], 128  }
 0x101   :  { %217 = vsyncadd [#allocation3], 4294967168 }
 0x102   :  { %144 = vsyncpa [#allocation3], 1 }

</bundles_post_ra>
